<compile_context>
chip_gen: v7x
topology: tpu7x:2x2x1
jax: 0.10.0
libtpu: 0.0.40
codegen_flags: <defaults>
</compile_context>

<pallas_src>
import numpy as np
import jax
import jax.numpy as jnp
from jax.experimental import pallas as pl
from jax.experimental.pallas import tpu as pltpu

HIDDEN1 = 128
HIDDEN2 = 64


def _round_up(n, m):
    return ((n + m - 1) // m) * m


def ppo_policy_kernel(x_ref, w1_ref, b1_ref, w2_ref, b2_ref,
                      wh_ref, bh_ref, out_ref):
    # Whole MLP hot path in VMEM: 3 matmuls + bias adds + 2 ReLUs.
    x = x_ref[...]                                                     # (TB, F)
    h1 = jnp.dot(x, w1_ref[...], preferred_element_type=jnp.float32)   # (TB, 128)
    h1 = jnp.maximum(h1 + b1_ref[...], 0.0)
    h2 = jnp.dot(h1, w2_ref[...], preferred_element_type=jnp.float32)  # (TB, 64)
    h2 = jnp.maximum(h2 + b2_ref[...], 0.0)
    # Fused actor+value head, lane-dense (padded to 128 output columns).
    out_ref[...] = (jnp.dot(h2, wh_ref[...],
                            preferred_element_type=jnp.float32)
                    + bh_ref[...])                                     # (TB, 128)


def ppo_policy_forward(obs, params):
    """obs: (B, C, H, W) float32. Returns (logits (B, A), value (B, 1))."""
    B = obs.shape[0]
    x = obs.reshape(B, -1).astype(jnp.float32)   # same order as torch view(B,-1)
    F = x.shape[1]
    w1, b1, w2, b2, wa, ba, wv, bv = params
    A = wa.shape[1]

    # ---- pack + lane-pad the fused head (A logits columns + 1 value column) --
    head_real = A + 1
    head_pad = _round_up(head_real, 128)
    wh = jnp.zeros((HIDDEN2, head_pad), jnp.float32)
    wh = wh.at[:, :A].set(wa).at[:, A:A + 1].set(wv)
    bh = jnp.zeros((1, head_pad), jnp.float32)
    bh = bh.at[:, :A].set(ba.reshape(1, A)).at[:, A:A + 1].set(bv.reshape(1, 1))

    # ---- pad batch to a tile multiple (>= sublane multiple of 8) -------------
    b8 = _round_up(B, 8)
    tb = min(128, b8)          # batch tile; small batches -> single grid step
    b_pad = _round_up(B, tb)
    if b_pad != B:
        x = jnp.concatenate(
            [x, jnp.zeros((b_pad - B, F), jnp.float32)], axis=0)
    n_tiles = b_pad // tb

    # ---- cost estimate (hint for XLA scheduling around the custom call) ------
    flops = 2 * b_pad * (F * HIDDEN1 + HIDDEN1 * HIDDEN2 + HIDDEN2 * head_pad)
    bytes_accessed = 4 * (b_pad * F + F * HIDDEN1 + HIDDEN1
                          + HIDDEN1 * HIDDEN2 + HIDDEN2
                          + HIDDEN2 * head_pad + head_pad
                          + b_pad * head_pad)
    cost = pl.CostEstimate(flops=flops, transcendentals=0,
                           bytes_accessed=bytes_accessed)

    resident = lambda shape: pl.BlockSpec(shape, lambda i: (0, 0))
    out = pl.pallas_call(
        ppo_policy_kernel,
        out_shape=jax.ShapeDtypeStruct((b_pad, head_pad), jnp.float32),
        grid=(n_tiles,),
        in_specs=[
            pl.BlockSpec((tb, F), lambda i: (i, 0)),        # x: streamed per tile
            resident((F, HIDDEN1)),                         # w1 (VMEM-resident)
            resident((1, HIDDEN1)),                         # b1
            resident((HIDDEN1, HIDDEN2)),                   # w2
            resident((1, HIDDEN2)),                         # b2
            resident((HIDDEN2, head_pad)),                  # fused head weight
            resident((1, head_pad)),                        # fused head bias
        ],
        out_specs=pl.BlockSpec((tb, head_pad), lambda i: (i, 0)),
        compiler_params=pltpu.CompilerParams(
            dimension_semantics=("parallel",)),
        cost_estimate=cost,
    )(x, w1, b1, w2, b2, wh, bh)

    logits = out[:B, :A]
    value = out[:B, A:A + 1]
    return logits, value


def init_params(key, flat_dim, action_dim):
    """Deterministic init mimicking nn.Linear's U(-1/sqrt(fan_in), ...).
    Weights stored as (in, out); biases as (1, out)."""
    def linear(k, fan_in, fan_out):
        kw, kb = jax.random.split(k)
        bound = 1.0 / np.sqrt(fan_in)
        w = jax.random.uniform(kw, (fan_in, fan_out), jnp.float32, -bound, bound)
        b = jax.random.uniform(kb, (1, fan_out), jnp.float32, -bound, bound)
        return w, b

    k1, k2, k3, k4 = jax.random.split(key, 4)
    w1, b1 = linear(k1, flat_dim, HIDDEN1)
    w2, b2 = linear(k2, HIDDEN1, HIDDEN2)
    wa, ba = linear(k3, HIDDEN2, action_dim)
    wv, bv = linear(k4, HIDDEN2, 1)
    return (w1, b1, w2, b2, wa, ba, wv, bv)


if __name__ == "__main__":
    # Small shapes consistent with the module: obs_shape=(4, 16, 16), batch=2.
    B, C, H, W = 2, 4, 16, 16
    ACTION_DIM = 6
    FLAT_DIM = C * H * W  # 1024

    key = jax.random.PRNGKey(0)
    k_obs, k_params = jax.random.split(key)
    obs = jax.random.normal(k_obs, (B, C, H, W), jnp.float32)
    params = init_params(k_params, FLAT_DIM, ACTION_DIM)

    logits, value = ppo_policy_forward(obs, params)
    jax.block_until_ready((logits, value))

    # Correctness check against plain-JAX reference (same math as PyTorch).
    x = obs.reshape(B, -1)
    w1, b1, w2, b2, wa, ba, wv, bv = params
    h1 = jnp.maximum(x @ w1 + b1, 0.0)
    h2 = jnp.maximum(h1 @ w2 + b2, 0.0)
    ref_logits = h2 @ wa + ba
    ref_value = h2 @ wv + bv
    assert logits.shape == (B, ACTION_DIM) and value.shape == (B, 1)
    np.testing.assert_allclose(np.asarray(logits), np.asarray(ref_logits),
                               rtol=1e-5, atol=1e-5)
    np.testing.assert_allclose(np.asarray(value), np.asarray(ref_value),
                               rtol=1e-5, atol=1e-5)

    print("KERNEL_OK")
</pallas_src>

<mosaic_0001>
module attributes {stable_mosaic.version = 11 : i64} {
  func.func @ppo_policy_kernel(%arg0: i32, %arg1: memref<8x1024xf32, #tpu.memory_space<vmem>>, %arg2: memref<1024x128xf32, #tpu.memory_space<vmem>>, %arg3: memref<1x128xf32, #tpu.memory_space<vmem>>, %arg4: memref<128x64xf32, #tpu.memory_space<vmem>>, %arg5: memref<1x64xf32, #tpu.memory_space<vmem>>, %arg6: memref<64x128xf32, #tpu.memory_space<vmem>>, %arg7: memref<1x128xf32, #tpu.memory_space<vmem>>, %arg8: memref<8x128xf32, #tpu.memory_space<vmem>>) attributes {dimension_semantics = [#tpu.dimension_semantics<parallel>], iteration_bounds = array<i64: 1>, scalar_prefetch = 0 : i64, scratch_operands = 0 : i64, tpu.core_type = #tpu.core_type<tc>, window_params = [{transform_indices = @transform_0, window_bounds = array<i64: 8, 1024>}, {pipeline_mode = #tpu.pipeline_mode<synchronous>, transform_indices = @transform_1, window_bounds = array<i64: 1024, 128>}, {pipeline_mode = #tpu.pipeline_mode<synchronous>, transform_indices = @transform_2, window_bounds = array<i64: 1, 128>}, {pipeline_mode = #tpu.pipeline_mode<synchronous>, transform_indices = @transform_3, window_bounds = array<i64: 128, 64>}, {pipeline_mode = #tpu.pipeline_mode<synchronous>, transform_indices = @transform_4, window_bounds = array<i64: 1, 64>}, {pipeline_mode = #tpu.pipeline_mode<synchronous>, transform_indices = @transform_5, window_bounds = array<i64: 64, 128>}, {pipeline_mode = #tpu.pipeline_mode<synchronous>, transform_indices = @transform_6, window_bounds = array<i64: 1, 128>}, {transform_indices = @transform_7, window_bounds = array<i64: 8, 128>}]} {
    %c0 = arith.constant 0 : index
    %c0_0 = arith.constant 0 : index
    %0 = vector.load %arg1[%c0, %c0_0] : memref<8x1024xf32, #tpu.memory_space<vmem>>, vector<8x1024xf32>
    %c0_1 = arith.constant 0 : index
    %c0_2 = arith.constant 0 : index
    %1 = vector.load %arg2[%c0_1, %c0_2] : memref<1024x128xf32, #tpu.memory_space<vmem>>, vector<1024x128xf32>
    %cst = arith.constant dense<0.000000e+00> : vector<8x128xf32>
    %2 = tpu.matmul %0, %1, %cst {dimension_numbers = #tpu.dot_dimension_numbers<[1], [0], [0], [1], [0, 0, 1, 1], [], []>} : vector<8x1024xf32>, vector<1024x128xf32>, vector<8x128xf32> -> vector<8x128xf32>
    %c0_3 = arith.constant 0 : index
    %c0_4 = arith.constant 0 : index
    %3 = vector.load %arg3[%c0_3, %c0_4] : memref<1x128xf32, #tpu.memory_space<vmem>>, vector<1x128xf32>
    %4 = vector.broadcast %3 : vector<1x128xf32> to vector<8x128xf32>
    %5 = arith.addf %2, %4 : vector<8x128xf32>
    %cst_5 = arith.constant 0.000000e+00 : f32
    %6 = vector.broadcast %cst_5 : f32 to vector<8x128xf32>
    %7 = arith.maximumf %5, %6 : vector<8x128xf32>
    %c0_6 = arith.constant 0 : index
    %c0_7 = arith.constant 0 : index
    %8 = vector.load %arg4[%c0_6, %c0_7] : memref<128x64xf32, #tpu.memory_space<vmem>>, vector<128x64xf32>
    %cst_8 = arith.constant dense<0.000000e+00> : vector<8x64xf32>
    %9 = tpu.matmul %7, %8, %cst_8 {dimension_numbers = #tpu.dot_dimension_numbers<[1], [0], [0], [1], [0, 0, 1, 1], [], []>} : vector<8x128xf32>, vector<128x64xf32>, vector<8x64xf32> -> vector<8x64xf32>
    %c0_9 = arith.constant 0 : index
    %c0_10 = arith.constant 0 : index
    %10 = vector.load %arg5[%c0_9, %c0_10] : memref<1x64xf32, #tpu.memory_space<vmem>>, vector<1x64xf32>
    %11 = vector.broadcast %10 : vector<1x64xf32> to vector<8x64xf32>
    %12 = arith.addf %9, %11 : vector<8x64xf32>
    %cst_11 = arith.constant 0.000000e+00 : f32
    %13 = vector.broadcast %cst_11 : f32 to vector<8x64xf32>
    %14 = arith.maximumf %12, %13 : vector<8x64xf32>
    %c0_12 = arith.constant 0 : index
    %c0_13 = arith.constant 0 : index
    %15 = vector.load %arg6[%c0_12, %c0_13] : memref<64x128xf32, #tpu.memory_space<vmem>>, vector<64x128xf32>
    %cst_14 = arith.constant dense<0.000000e+00> : vector<8x128xf32>
    %16 = tpu.matmul %14, %15, %cst_14 {dimension_numbers = #tpu.dot_dimension_numbers<[1], [0], [0], [1], [0, 0, 1, 1], [], []>} : vector<8x64xf32>, vector<64x128xf32>, vector<8x128xf32> -> vector<8x128xf32>
    %c0_15 = arith.constant 0 : index
    %c0_16 = arith.constant 0 : index
    %17 = vector.load %arg7[%c0_15, %c0_16] : memref<1x128xf32, #tpu.memory_space<vmem>>, vector<1x128xf32>
    %18 = vector.broadcast %17 : vector<1x128xf32> to vector<8x128xf32>
    %19 = arith.addf %16, %18 : vector<8x128xf32>
    %c0_17 = arith.constant 0 : index
    %c0_18 = arith.constant 0 : index
    %20 = vector.load %arg8[%c0_17, %c0_18] : memref<8x128xf32, #tpu.memory_space<vmem>>, vector<8x128xf32>
    tpu.vector_store %arg8[%c0_17, %c0_18], %19 {strides = array<i32>} : memref<8x128xf32, #tpu.memory_space<vmem>>, vector<8x128xf32>,
    return
  }
  func.func @transform_0(%arg0: i32) -> (i32, i32) {
    %c0_i32 = arith.constant 0 : i32
    %c0_i32_0 = arith.constant 0 : i32
    return %arg0, %c0_i32 : i32, i32
  }
  func.func @transform_1(%arg0: i32) -> (i32, i32) {
    %c0_i32 = arith.constant 0 : i32
    %c0_i32_0 = arith.constant 0 : i32
    %c0_i32_1 = arith.constant 0 : i32
    return %c0_i32, %c0_i32_0 : i32, i32
  }
  func.func @transform_2(%arg0: i32) -> (i32, i32) {
    %c0_i32 = arith.constant 0 : i32
    %c0_i32_0 = arith.constant 0 : i32
    %c0_i32_1 = arith.constant 0 : i32
    return %c0_i32, %c0_i32_0 : i32, i32
  }
  func.func @transform_3(%arg0: i32) -> (i32, i32) {
    %c0_i32 = arith.constant 0 : i32
    %c0_i32_0 = arith.constant 0 : i32
    %c0_i32_1 = arith.constant 0 : i32
    return %c0_i32, %c0_i32_0 : i32, i32
  }
  func.func @transform_4(%arg0: i32) -> (i32, i32) {
    %c0_i32 = arith.constant 0 : i32
    %c0_i32_0 = arith.constant 0 : i32
    %c0_i32_1 = arith.constant 0 : i32
    return %c0_i32, %c0_i32_0 : i32, i32
  }
  func.func @transform_5(%arg0: i32) -> (i32, i32) {
    %c0_i32 = arith.constant 0 : i32
    %c0_i32_0 = arith.constant 0 : i32
    %c0_i32_1 = arith.constant 0 : i32
    return %c0_i32, %c0_i32_0 : i32, i32
  }
  func.func @transform_6(%arg0: i32) -> (i32, i32) {
    %c0_i32 = arith.constant 0 : i32
    %c0_i32_0 = arith.constant 0 : i32
    %c0_i32_1 = arith.constant 0 : i32
    return %c0_i32, %c0_i32_0 : i32, i32
  }
  func.func @transform_7(%arg0: i32) -> (i32, i32) {
    %c0_i32 = arith.constant 0 : i32
    %c0_i32_0 = arith.constant 0 : i32
    return %arg0, %c0_i32 : i32, i32
  }
}

</mosaic_0001>

<bundles_post_ra>
// kernel: tpu_custom_call.1
= control target key start
LH: loop header
LB: loop body
LE: loop exit
PB: predicated region body
PF: predicated region fallthrough
CT: control target
= control target key end

     0   :  { %12 = vsyncpa [#allocation3], 0  ;;  %s1283_s0 = inlined_call_operand.vmem [shape: f32[8,1024], index: 0, kind: input, shape index: {}]   ;;  %s1284_s1 = inlined_call_operand.hbm [shape: f32[1024,128], index: 1, kind: input, shape index: {}]   ;;  %s1285_s2 = inlined_call_operand.vmem [shape: f32[1,128], index: 2, kind: input, shape index: {}]   ;;  %s1286_s3 = inlined_call_operand.vmem [shape: f32[128,64], index: 3, kind: input, shape index: {}]   ;;  %s1287_s4 = inlined_call_operand.vmem [shape: f32[1,64], index: 4, kind: input, shape index: {}]   ;;  %s1288_s5 = inlined_call_operand.vmem [shape: f32[64,128], index: 5, kind: input, shape index: {}]   ;;  %s1289_s6 = inlined_call_operand.vmem [shape: f32[1,128], index: 6, kind: input, shape index: {}]   ;;  %s1290_s7 = inlined_call_operand.hbm [shape: f32[8,128], index: 7, kind: output, shape index: {}]  }
   0x1   :  { %13 = vsyncpa [#allocation4], 0  ;;  %s1107_s24 = smov [#allocation2]   ;;  %s1059_s28 = scalar_lea.hbm %s1284_s1, 16384 }
   0x2   :  { %s21_s25 = sshll.u32 %s1107_s24, 4  ;;  %p1060_p0 = scmp.ne.s32.totalorder %s1284_s1, %s1059_s28  ;;  %s22_s25 = int_to_ptr.vmem [resolvable:$true] %s21_s25 }
   0x3   :  { %p1063_p1 = scmp.lt.u32.totalorder %s1059_s28, %s1284_s1 }
   0x5   :  { %p1065_p2 = pnand %p1063_p1, %p1060_p0 }
   0x7   :  { %1068 = shalt.err (!%p1065_p2)
}
   0x8   :  { %s1069_s10 = scalar_lea.vmem %s22_s25, 16384  ;;  %p1074_p4 = scmp.lt.s32.totalorder %s22_s25, %s22_s25 }
   0x9   :  { %p1070_p3 = scmp.ne.s32.totalorder %s22_s25, %s1069_s10  ;;  %p1075_p5 = scmp.lt.s32.totalorder %s1069_s10, %s1069_s10 }
   0xb   :  { %p1076_p6 = por %p1075_p5, %p1074_p4 }
   0xd   :  { %p1077_p7 = pnand %p1076_p6, %p1070_p3 }
   0xf   :  { %1080 = shalt.err (!%p1077_p7)
}
  0x10   :  { %s1108_s11 = smov 128   ;;  %s1109_s12 = smov 8  }
  0x11   :  { %27 = dma.hbm_to_vmem [thread:$0]  %s1284_s1, 16384, %s22_s25, [#allocation3], %s1108_s11, %s1108_s11, %s1109_s12  }
  0x12   :  { %1103 = dma.done.wait [#allocation3], 16384  }
  0x13   :  { %1104 = vsyncadd [#allocation3], 4294950912  ;;  %v65_v0 = vld [vmem:[#allocation2 + $0x80] sm:$0xff]  ;;  %v66_v1 = vld [vmem:[#allocation2 + $0x88] sm:$0xff]  ;;  %vm1111_vm0 = vmmov 0   ;;  %vm574_vm1 = vcmask 523264  }
  0x14   :  { %v49_v2 = vld [vmem:[#allocation2] sm:$0xff]  ;;  %v888_v3 = vpack.c.bf16 %v66_v1, %v65_v0  ;;  %v50_v4 = vld [vmem:[#allocation2 + $0x8] sm:$0xff]  ;;  %v67_v11 = vld [vmem:[#allocation2 + $0x90] sm:$0xff]  ;;  %s1113_s9 = smov [#allocation5]  }
  0x15   :  { %v97_v5 = vld [vmem:[#allocation2 + $0x180] sm:$0xff]  ;;  %v98_v6 = vld [vmem:[#allocation2 + $0x188] sm:$0xff]  ;;  %v890_v7 = vpack.c.bf16 %v50_v4, %v49_v2  ;;  %v68_v13 = vld [vmem:[#allocation2 + $0x98] sm:$0xff]  ;;  %s655_s10 = sshll.u32 %s1113_s9, 4  ;;  %s656_s10 = int_to_ptr.vmem [resolvable:$true] %s655_s10 }
  0x16   :  { %v920_v8 = vpack.c.bf16 %v98_v6, %v97_v5  ;;  %v81_v9 = vld [vmem:[#allocation2 + $0x100] sm:$0xff]  ;;  %v82_v10 = vld [vmem:[#allocation2 + $0x108] sm:$0xff]  ;;  %889 = vmatprep.subr.bf16.mxu0 %v888_v3  ;;  %v51_v14 = vld [vmem:[#allocation2 + $0x10] sm:$0xff]  ;;  %v892_v16 = vpack.c.bf16 %v68_v13, %v67_v11  ;;  %p1086_p9 = scmp.lt.s32.totalorder %s656_s10, %s656_s10 }
  0x17   :  { %v922_v12 = vpack.c.bf16 %v82_v10, %v81_v9  ;;  %v52_v15 = vld [vmem:[#allocation2 + $0x18] sm:$0xff]  ;;  %891 = vmatpush3.bf16.msra.mxu0 %v890_v7  ;;  %v99_v18 = vld [vmem:[#allocation2 + $0x190] sm:$0xff]  ;;  %v69_v23 = vld [vmem:[#allocation2 + $0xa0] sm:$0xff] }
  0x18   :  { %921 = vmatprep.subr.bf16.mxu1 %v920_v8  ;;  %v894_v17 = vpack.c.bf16 %v52_v15, %v51_v14  ;;  %v100_v19 = vld [vmem:[#allocation2 + $0x198] sm:$0xff]  ;;  %v83_v20 = vld [vmem:[#allocation2 + $0x110] sm:$0xff]  ;;  %v70_v24 = vld [vmem:[#allocation2 + $0xa8] sm:$0xff]  ;;  %893 = vmatprep.subr.bf16.mxu0 %v892_v16 }
  0x19   :  { %923 = vmatpush3.bf16.msra.mxu1 %v922_v12  ;;  %v924_v21 = vpack.c.bf16 %v100_v19, %v99_v18  ;;  %v84_v22 = vld [vmem:[#allocation2 + $0x118] sm:$0xff]  ;;  %v896_v26 = vpack.c.bf16 %v70_v24, %v69_v23  ;;  %v53_v27 = vld [vmem:[#allocation2 + $0x20] sm:$0xff]  ;;  %v54_v28 = vld [vmem:[#allocation2 + $0x28] sm:$0xff] }
  0x1a   :  { %v926_v25 = vpack.c.bf16 %v84_v22, %v83_v20  ;;  %v101_v29 = vld [vmem:[#allocation2 + $0x1a0] sm:$0xff]  ;;  %v102_v30 = vld [vmem:[#allocation2 + $0x1a8] sm:$0xff]  ;;  %v898_v33 = vpack.c.bf16 %v54_v28, %v53_v27  ;;  %v71_v35 = vld [vmem:[#allocation2 + $0xb0] sm:$0xff] }
  0x1b   :  { %925 = vmatprep.subr.bf16.mxu1 %v924_v21  ;;  %v85_v31 = vld [vmem:[#allocation2 + $0x120] sm:$0xff]  ;;  %v86_v32 = vld [vmem:[#allocation2 + $0x128] sm:$0xff]  ;;  %895 = vmatpush3.bf16.msra.mxu0 %v894_v17  ;;  %v928_v34 = vpack.c.bf16 %v102_v30, %v101_v29  ;;  %v72_v36 = vld [vmem:[#allocation2 + $0xb8] sm:$0xff] }
  0x1c   :  { %v55_v37 = vld [vmem:[#allocation2 + $0x30] sm:$0xff]  ;;  %897 = vmatprep.subr.bf16.mxu0 %v896_v26  ;;  %v930_v38 = vpack.c.bf16 %v86_v32, %v85_v31  ;;  %v900_v39 = vpack.c.bf16 %v72_v36, %v71_v35  ;;  %v56_v40 = vld [vmem:[#allocation2 + $0x38] sm:$0xff]  ;;  %v73_v46 = vld [vmem:[#allocation2 + $0xc0] sm:$0xff] }
  0x1d   :  { %927 = vmatpush3.bf16.msra.mxu1 %v926_v25  ;;  %v103_v41 = vld [vmem:[#allocation2 + $0x1b0] sm:$0xff]  ;;  %v104_v42 = vld [vmem:[#allocation2 + $0x1b8] sm:$0xff]  ;;  %v74_v47 = vld [vmem:[#allocation2 + $0xc8] sm:$0xff]  ;;  %v902_v48 = vpack.c.bf16 %v56_v40, %v55_v37 }
  0x1e   :  { %929 = vmatprep.subr.bf16.mxu1 %v928_v34  ;;  %v932_v43 = vpack.c.bf16 %v104_v42, %v103_v41  ;;  %v87_v44 = vld [vmem:[#allocation2 + $0x130] sm:$0xff]  ;;  %v88_v45 = vld [vmem:[#allocation2 + $0x138] sm:$0xff]  ;;  %v105_v49 = vld [vmem:[#allocation2 + $0x1c0] sm:$0xff]  ;;  %v904_v52 = vpack.c.bf16 %v74_v47, %v73_v46 }
  0x1f   :  { %899 = vmatpush3.bf16.msra.mxu0 %v898_v33  ;;  %v106_v50 = vld [vmem:[#allocation2 + $0x1c8] sm:$0xff]  ;;  %v934_v51 = vpack.c.bf16 %v88_v45, %v87_v44  ;;  %v57_v53 = vld [vmem:[#allocation2 + $0x40] sm:$0xff]  ;;  %v75_v58 = vld [vmem:[#allocation2 + $0xd0] sm:$0xff] }
  0x20   :  { %901 = vmatprep.subr.bf16.mxu0 %v900_v39  ;;  %v58_v54 = vld [vmem:[#allocation2 + $0x48] sm:$0xff]  ;;  %v89_v55 = vld [vmem:[#allocation2 + $0x140] sm:$0xff]  ;;  %v936_v56 = vpack.c.bf16 %v106_v50, %v105_v49  ;;  %v76_v59 = vld [vmem:[#allocation2 + $0xd8] sm:$0xff] }
  0x21   :  { %931 = vmatpush3.bf16.msra.mxu1 %v930_v38  ;;  %v90_v57 = vld [vmem:[#allocation2 + $0x148] sm:$0xff]  ;;  %v107_v60 = vld [vmem:[#allocation2 + $0x1d0] sm:$0xff]  ;;  %v108_v61 = vld [vmem:[#allocation2 + $0x1d8] sm:$0xff]  ;;  %v906_v62 = vpack.c.bf16 %v58_v54, %v57_v53  ;;  %v908_v0 = vpack.c.bf16 %v76_v59, %v75_v58 }
  0x22   :  { %933 = vmatprep.subr.bf16.mxu1 %v932_v43  ;;  %v938_v63 = vpack.c.bf16 %v90_v57, %v89_v55  ;;  %v59_v1 = vld [vmem:[#allocation2 + $0x50] sm:$0xff]  ;;  %v60_v2 = vld [vmem:[#allocation2 + $0x58] sm:$0xff]  ;;  %v940_v4 = vpack.c.bf16 %v108_v61, %v107_v60  ;;  %v77_v6 = vld [vmem:[#allocation2 + $0xe0] sm:$0xff] }
  0x23   :  { %903 = vmatpush3.bf16.msra.mxu0 %v902_v48  ;;  %v91_v3 = vld [vmem:[#allocation2 + $0x150] sm:$0xff]  ;;  %v92_v5 = vld [vmem:[#allocation2 + $0x158] sm:$0xff]  ;;  %v78_v7 = vld [vmem:[#allocation2 + $0xe8] sm:$0xff]  ;;  %v910_v10 = vpack.c.bf16 %v60_v2, %v59_v1 }
  0x24   :  { %905 = vmatprep.subr.bf16.mxu0 %v904_v52  ;;  %v109_v8 = vld [vmem:[#allocation2 + $0x1e0] sm:$0xff]  ;;  %v110_v9 = vld [vmem:[#allocation2 + $0x1e8] sm:$0xff]  ;;  %v942_v13 = vpack.c.bf16 %v92_v5, %v91_v3  ;;  %v912_v14 = vpack.c.bf16 %v78_v7, %v77_v6  ;;  %v79_v19 = vld [vmem:[#allocation2 + $0xf0] sm:$0xff] }
  0x25   :  { %935 = vmatpush3.bf16.msra.mxu1 %v934_v51  ;;  %v61_v11 = vld [vmem:[#allocation2 + $0x60] sm:$0xff]  ;;  %v62_v12 = vld [vmem:[#allocation2 + $0x68] sm:$0xff]  ;;  %v944_v18 = vpack.c.bf16 %v110_v9, %v109_v8  ;;  %v80_v20 = vld [vmem:[#allocation2 + $0xf8] sm:$0xff] }
  0x26   :  { %937 = vmatprep.subr.bf16.mxu1 %v936_v56  ;;  %v93_v15 = vld [vmem:[#allocation2 + $0x160] sm:$0xff]  ;;  %v94_v16 = vld [vmem:[#allocation2 + $0x168] sm:$0xff]  ;;  %v44_v21 = vld [vmem:[%s1283_s0 + $0x18] sm:$0xff]  ;;  %v914_v24 = vpack.c.bf16 %v62_v12, %v61_v11  ;;  %v916_v26 = vpack.c.bf16 %v80_v20, %v79_v19 }
  0x27   :  { %907 = vmatpush3.bf16.msra.mxu0 %v906_v62  ;;  %v42_v17 = vld [vmem:[%s1283_s0 + $0x8] sm:$0xff]  ;;  %v111_v22 = vld [vmem:[#allocation2 + $0x1f0] sm:$0xff]  ;;  %v112_v23 = vld [vmem:[#allocation2 + $0x1f8] sm:$0xff]  ;;  %318 = vmatprep.mubr.f32.mxu1 %v44_v21  ;;  %v946_v25 = vpack.c.bf16 %v94_v16, %v93_v15 }
  0x28   :  { %909 = vmatprep.subr.bf16.mxu0 %v908_v0  ;;  %248 = vmatprep.mubr.f32.mxu0 %v42_v17  ;;  %v63_v27 = vld [vmem:[#allocation2 + $0x70] sm:$0xff]  ;;  %v64_v28 = vld [vmem:[#allocation2 + $0x78] sm:$0xff]  ;;  %v948_v30 = vpack.c.bf16 %v112_v23, %v111_v22  ;;  %v129_v32 = vld [vmem:[#allocation2 + $0x280] sm:$0xff] }
  0x29   :  { %939 = vmatpush3.bf16.msra.mxu1 %v938_v63  ;;  %v95_v29 = vld [vmem:[#allocation2 + $0x170] sm:$0xff]  ;;  %v96_v31 = vld [vmem:[#allocation2 + $0x178] sm:$0xff]  ;;  %v130_v33 = vld [vmem:[#allocation2 + $0x288] sm:$0xff]  ;;  %v918_v36 = vpack.c.bf16 %v64_v28, %v63_v27 }
  0x2a   :  { %941 = vmatprep.subr.bf16.mxu1 %v940_v4  ;;  %v161_v34 = vld [vmem:[#allocation2 + $0x380] sm:$0xff]  ;;  %v162_v35 = vld [vmem:[#allocation2 + $0x388] sm:$0xff]  ;;  %v950_v37 = vpack.c.bf16 %v96_v31, %v95_v29  ;;  %v952_v38 = vpack.c.bf16 %v130_v33, %v129_v32  ;;  %v131_v44 = vld [vmem:[#allocation2 + $0x290] sm:$0xff] }
  0x2b   :  { %911 = vmatpush3.bf16.msra.mxu0 %v910_v10  ;;  %v113_v39 = vld [vmem:[#allocation2 + $0x200] sm:$0xff]  ;;  %v114_v40 = vld [vmem:[#allocation2 + $0x208] sm:$0xff]  ;;  %v984_v42 = vpack.c.bf16 %v162_v35, %v161_v34  ;;  %v132_v45 = vld [vmem:[#allocation2 + $0x298] sm:$0xff] }
  0x2c   :  { %913 = vmatprep.subr.bf16.mxu0 %v912_v14  ;;  %v145_v41 = vld [vmem:[#allocation2 + $0x300] sm:$0xff]  ;;  %v146_v43 = vld [vmem:[#allocation2 + $0x308] sm:$0xff]  ;;  %v163_v46 = vld [vmem:[#allocation2 + $0x390] sm:$0xff]  ;;  %v954_v49 = vpack.c.bf16 %v114_v40, %v113_v39  ;;  %v956_v52 = vpack.c.bf16 %v132_v45, %v131_v44 }
  0x2d   :  { %943 = vmatpush3.bf16.msra.mxu1 %v942_v13  ;;  %v164_v47 = vld [vmem:[#allocation2 + $0x398] sm:$0xff]  ;;  %v41_v48 = vld [vmem:[%s1283_s0] sm:$0xff]  ;;  %v43_v50 = vld [vmem:[%s1283_s0 + $0x10] sm:$0xff]  ;;  %v986_v51 = vpack.c.bf16 %v146_v43, %v145_v41 }
  0x2e   :  { %945 = vmatprep.subr.bf16.mxu1 %v944_v18  ;;  %v115_v53 = vld [vmem:[#allocation2 + $0x210] sm:$0xff]  ;;  %v116_v54 = vld [vmem:[#allocation2 + $0x218] sm:$0xff]  ;;  %v988_v56 = vpack.c.bf16 %v164_v47, %v163_v46  ;;  %v133_v58 = vld [vmem:[#allocation2 + $0x2a0] sm:$0xff] }
  0x2f   :  { %915 = vmatpush3.bf16.msra.mxu0 %v914_v24  ;;  %v147_v55 = vld [vmem:[#allocation2 + $0x310] sm:$0xff]  ;;  %v148_v57 = vld [vmem:[#allocation2 + $0x318] sm:$0xff]  ;;  %v134_v59 = vld [vmem:[#allocation2 + $0x2a8] sm:$0xff]  ;;  %v958_v62 = vpack.c.bf16 %v116_v54, %v115_v53 }
  0x30   :  { %917 = vmatprep.subr.bf16.mxu0 %v916_v26  ;;  %v165_v60 = vld [vmem:[#allocation2 + $0x3a0] sm:$0xff]  ;;  %v166_v61 = vld [vmem:[#allocation2 + $0x3a8] sm:$0xff]  ;;  %v990_v63 = vpack.c.bf16 %v148_v57, %v147_v55  ;;  %v960_v0 = vpack.c.bf16 %v134_v59, %v133_v58  ;;  %v135_v6 = vld [vmem:[#allocation2 + $0x2b0] sm:$0xff] }
  0x31   :  { %947 = vmatpush3.bf16.msra.mxu1 %v946_v25  ;;  %v117_v1 = vld [vmem:[#allocation2 + $0x220] sm:$0xff]  ;;  %v118_v2 = vld [vmem:[#allocation2 + $0x228] sm:$0xff]  ;;  %v992_v4 = vpack.c.bf16 %v166_v61, %v165_v60  ;;  %v136_v7 = vld [vmem:[#allocation2 + $0x2b8] sm:$0xff] }
  0x32   :  { %949 = vmatprep.subr.bf16.mxu1 %v948_v30  ;;  %v149_v3 = vld [vmem:[#allocation2 + $0x320] sm:$0xff]  ;;  %v150_v5 = vld [vmem:[#allocation2 + $0x328] sm:$0xff]  ;;  %v167_v8 = vld [vmem:[#allocation2 + $0x3b0] sm:$0xff]  ;;  %v962_v10 = vpack.c.bf16 %v118_v2, %v117_v1  ;;  %v964_v12 = vpack.c.bf16 %v136_v7, %v135_v6 }
  0x33   :  { %919 = vmatpush3.bf16.msra.mxu0 %v918_v36  ;;  %v168_v9 = vld [vmem:[#allocation2 + $0x3b8] sm:$0xff]  ;;  %v994_v11 = vpack.c.bf16 %v150_v5, %v149_v3  ;;  %v119_v13 = vld [vmem:[#allocation2 + $0x230] sm:$0xff]  ;;  %v137_v18 = vld [vmem:[#allocation2 + $0x2c0] sm:$0xff] }
  0x34   :  { %953 = vmatprep.subr.bf16.mxu0 %v952_v38  ;;  %v120_v14 = vld [vmem:[#allocation2 + $0x238] sm:$0xff]  ;;  %v151_v15 = vld [vmem:[#allocation2 + $0x330] sm:$0xff]  ;;  %v996_v16 = vpack.c.bf16 %v168_v9, %v167_v8  ;;  %v138_v19 = vld [vmem:[#allocation2 + $0x2c8] sm:$0xff] }
  0x35   :  { %951 = vmatpush3.bf16.msra.mxu1 %v950_v37  ;;  %v152_v17 = vld [vmem:[#allocation2 + $0x338] sm:$0xff]  ;;  %v169_v20 = vld [vmem:[#allocation2 + $0x3c0] sm:$0xff]  ;;  %v170_v21 = vld [vmem:[#allocation2 + $0x3c8] sm:$0xff]  ;;  %v966_v22 = vpack.c.bf16 %v120_v14, %v119_v13  ;;  %v968_v26 = vpack.c.bf16 %v138_v19, %v137_v18 }
  0x36   :  { %985 = vmatprep.subr.bf16.mxu1 %v984_v42  ;;  %249 = vmatmul.mubr.f32.vlgmr.msra.gmra.mrb[0].mxu0 %v41_v48  ;;  %v46_v23 = vld [vmem:[%s1283_s0 + $0x28] sm:$0xff]  ;;  %v48_v24 = vld [vmem:[%s1283_s0 + $0x38] sm:$0xff]  ;;  %v998_v25 = vpack.c.bf16 %v152_v17, %v151_v15  ;;  %v121_v27 = vld [vmem:[#allocation2 + $0x240] sm:$0xff]  ;;  %v1000_v30 = vpack.c.bf16 %v170_v21, %v169_v20 }
  0x37   :  { %955 = vmatpush3.bf16.msra.mxu0 %v954_v49  ;;  %v122_v28 = vld [vmem:[#allocation2 + $0x248] sm:$0xff]  ;;  %v153_v29 = vld [vmem:[#allocation2 + $0x340] sm:$0xff]  ;;  %v139_v32 = vld [vmem:[#allocation2 + $0x2d0] sm:$0xff]  ;;  %388 = vmatprep.mubr.f32.mxu0 %v46_v23 }
  0x38   :  { %319 = vmatmul.mubr.f32.vlgmr.msra.gmra.mrb[0].mxu1 %v43_v50  ;;  %957 = vmatprep.subr.bf16.mxu0 %v956_v52  ;;  %v154_v31 = vld [vmem:[#allocation2 + $0x348] sm:$0xff]  ;;  %v140_v33 = vld [vmem:[#allocation2 + $0x2d8] sm:$0xff]  ;;  %v171_v34 = vld [vmem:[#allocation2 + $0x3d0] sm:$0xff]  ;;  %v970_v36 = vpack.c.bf16 %v122_v28, %v121_v27 }
  0x39   :  { %987 = vmatpush3.bf16.msra.mxu1 %v986_v51  ;;  %v172_v35 = vld [vmem:[#allocation2 + $0x3d8] sm:$0xff]  ;;  %458 = vmatprep.mubr.f32.mxu1 %v48_v24  ;;  %v1002_v37 = vpack.c.bf16 %v154_v31, %v153_v29  ;;  %v972_v38 = vpack.c.bf16 %v140_v33, %v139_v32  ;;  %v123_v39 = vld [vmem:[#allocation2 + $0x250] sm:$0xff]  ;;  %v141_v44 = vld [vmem:[#allocation2 + $0x2e0] sm:$0xff]  ;;  %v1112_v33 = vmov 0.0  }
  0x3a   :  { %989 = vmatprep.subr.bf16.mxu1 %v988_v56  ;;  %v124_v40 = vld [vmem:[#allocation2 + $0x258] sm:$0xff]  ;;  %v155_v41 = vld [vmem:[#allocation2 + $0x350] sm:$0xff]  ;;  %v1004_v42 = vpack.c.bf16 %v172_v35, %v171_v34  ;;  %v142_v45 = vld [vmem:[#allocation2 + $0x2e8] sm:$0xff] }
  0x3b   :  { %959 = vmatpush3.bf16.msra.mxu0 %v958_v62  ;;  %v156_v43 = vld [vmem:[#allocation2 + $0x358] sm:$0xff]  ;;  %v173_v46 = vld [vmem:[#allocation2 + $0x3e0] sm:$0xff]  ;;  %v174_v47 = vld [vmem:[#allocation2 + $0x3e8] sm:$0xff]  ;;  %v974_v48 = vpack.c.bf16 %v124_v40, %v123_v39  ;;  %v976_v50 = vpack.c.bf16 %v142_v45, %v141_v44 }
  0x3c   :  { %961 = vmatprep.subr.bf16.mxu0 %v960_v0  ;;  %v1006_v49 = vpack.c.bf16 %v156_v43, %v155_v41  ;;  %v125_v51 = vld [vmem:[#allocation2 + $0x260] sm:$0xff]  ;;  %v126_v52 = vld [vmem:[#allocation2 + $0x268] sm:$0xff]  ;;  %v1008_v54 = vpack.c.bf16 %v174_v47, %v173_v46  ;;  %v143_v56 = vld [vmem:[#allocation2 + $0x2f0] sm:$0xff] }
  0x3d   :  { %991 = vmatpush3.bf16.msra.mxu1 %v990_v63  ;;  %v157_v53 = vld [vmem:[#allocation2 + $0x360] sm:$0xff]  ;;  %v158_v55 = vld [vmem:[#allocation2 + $0x368] sm:$0xff]  ;;  %v144_v57 = vld [vmem:[#allocation2 + $0x2f8] sm:$0xff]  ;;  %v978_v60 = vpack.c.bf16 %v126_v52, %v125_v51 }
  0x3e   :  { %993 = vmatprep.subr.bf16.mxu1 %v992_v4  ;;  %v175_v58 = vld [vmem:[#allocation2 + $0x3f0] sm:$0xff]  ;;  %v176_v59 = vld [vmem:[#allocation2 + $0x3f8] sm:$0xff]  ;;  %v1010_v61 = vpack.c.bf16 %v158_v55, %v157_v53  ;;  %v980_v62 = vpack.c.bf16 %v144_v57, %v143_v56  ;;  %v45_v6 = vld [vmem:[%s1283_s0 + $0x20] sm:$0xff] }
  0x3f   :  { %963 = vmatpush3.bf16.msra.mxu0 %v962_v10  ;;  %v127_v63 = vld [vmem:[#allocation2 + $0x270] sm:$0xff]  ;;  %v128_v0 = vld [vmem:[#allocation2 + $0x278] sm:$0xff]  ;;  %v1012_v1 = vpack.c.bf16 %v176_v59, %v175_v58  ;;  %v465_v8 = vld [vmem:[%s1286_s3] sm:$0xff] }
  0x40   :  { %965 = vmatprep.subr.bf16.mxu0 %v964_v12  ;;  %v159_v2 = vld [vmem:[#allocation2 + $0x370] sm:$0xff]  ;;  %v160_v3 = vld [vmem:[#allocation2 + $0x378] sm:$0xff]  ;;  %v982_v4 = vpack.c.bf16 %v128_v0, %v127_v63  ;;  %v466_v9 = vld [vmem:[%s1286_s3 + $0x8] sm:$0xff] }
  0x41   :  { %995 = vmatpush3.bf16.msra.mxu1 %v994_v11  ;;  %v1014_v5 = vpack.c.bf16 %v160_v3, %v159_v2  ;;  %v47_v7 = vld [vmem:[%s1283_s0 + $0x30] sm:$0xff]  ;;  %v1110_v11 = vmov 0.0|0.0   ;;  %v1017_v12 = vpack.c.bf16 %v466_v9, %v465_v8  ;;  %v468_v13 = vld [vmem:[%s1286_s3 + $0x18] sm:$0xff]  ;;  %v469_v15 = vld [vmem:[%s1286_s3 + $0x20] sm:$0xff] }
  0x42   :  { %997 = vmatprep.subr.bf16.mxu1 %v996_v16  ;;  %v467_v10 = vld [vmem:[%s1286_s3 + $0x10] sm:$0xff]  ;;  %v470_v16 = vld [vmem:[%s1286_s3 + $0x28] sm:$0xff]  ;;  %v472_v19 = vld [vmem:[%s1286_s3 + $0x38] sm:$0xff] }
  0x43   :  { %967 = vmatpush3.bf16.msra.mxu0 %v966_v22  ;;  %v1020_v14 = vpack.c.bf16 %v468_v13, %v467_v10  ;;  %v1023_v17 = vpack.c.bf16 %v470_v16, %v469_v15  ;;  %v471_v18 = vld [vmem:[%s1286_s3 + $0x30] sm:$0xff]  ;;  %v473_v21 = vld [vmem:[%s1286_s3 + $0x40] sm:$0xff]  ;;  %v474_v22 = vld [vmem:[%s1286_s3 + $0x48] sm:$0xff] }
  0x44   :  { %969 = vmatprep.subr.bf16.mxu0 %v968_v26  ;;  %v1026_v20 = vpack.c.bf16 %v472_v19, %v471_v18  ;;  %v1029_v23 = vpack.c.bf16 %v474_v22, %v473_v21  ;;  %v475_v24 = vld [vmem:[%s1286_s3 + $0x50] sm:$0xff]  ;;  %v477_v27 = vld [vmem:[%s1286_s3 + $0x60] sm:$0xff]  ;;  %v478_v28 = vld [vmem:[%s1286_s3 + $0x68] sm:$0xff] }
  0x45   :  { %999 = vmatpush3.bf16.msra.mxu1 %v998_v25  ;;  %v476_v25 = vld [vmem:[%s1286_s3 + $0x58] sm:$0xff]  ;;  %v1035_v29 = vpack.c.bf16 %v478_v28, %v477_v27  ;;  %v559_v34 = vld [vmem:[%s1288_s5] sm:$0xff]  ;;  %v560_v35 = vld [vmem:[%s1288_s5 + $0x8] sm:$0xff] }
  0x46   :  { %1001 = vmatprep.subr.bf16.mxu1 %v1000_v30  ;;  %v1032_v26 = vpack.c.bf16 %v476_v25, %v475_v24  ;;  %v479_v30 = vld [vmem:[%s1286_s3 + $0x70] sm:$0xff]  ;;  %v480_v31 = vld [vmem:[%s1286_s3 + $0x78] sm:$0xff]  ;;  %v563_v40 = vld [vmem:[%s1288_s5 + $0x20] sm:$0xff] }
  0x47   :  { %971 = vmatpush3.bf16.msra.mxu0 %v970_v36  ;;  %v1038_v32 = vpack.c.bf16 %v480_v31, %v479_v30  ;;  %v561_v36 = vld [vmem:[%s1288_s5 + $0x10] sm:$0xff]  ;;  %v564_v41 = vld [vmem:[%s1288_s5 + $0x28] sm:$0xff]  ;;  %v664_v44 = vld [vmem:[%s1285_s2] ss:$0 sm:$0xff] }
  0x48   :  { %973 = vmatprep.subr.bf16.mxu0 %v972_v38  ;;  %v562_v38 = vld [vmem:[%s1288_s5 + $0x18] sm:$0xff]  ;;  %v665_v0 = vld [vmem:[%s1287_s4] ss:$0 sm:$0xff] }
  0x49   :  { %1003 = vmatpush3.bf16.msra.mxu1 %v1002_v37  ;;  %v1041_v37 = vpack.c.bf16 %v560_v35, %v559_v34  ;;  %v1044_v39 = vpack.c.bf16 %v562_v38, %v561_v36 }
  0x4a   :  { %1005 = vmatprep.subr.bf16.mxu1 %v1004_v42  ;;  %v1047_v42 = vpack.c.bf16 %v564_v41, %v563_v40 }
  0x4b   :  { %975 = vmatpush3.bf16.msra.mxu0 %v974_v48 }
  0x4c   :  { %977 = vmatprep.subr.bf16.mxu0 %v976_v50 }
  0x4d   :  { %1007 = vmatpush3.bf16.msra.mxu1 %v1006_v49 }
  0x4e   :  { %1009 = vmatprep.subr.bf16.mxu1 %v1008_v54 }
  0x4f   :  { %979 = vmatpush3.bf16.msra.mxu0 %v978_v60 }
  0x50   :  { %981 = vmatprep.subr.bf16.mxu0 %v980_v62  ;;  %v566_v62 = vld [vmem:[%s1288_s5 + $0x38] sm:$0xff] }
  0x51   :  { %1011 = vmatpush3.bf16.msra.mxu1 %v1010_v61  ;;  %v565_v61 = vld [vmem:[%s1288_s5 + $0x30] sm:$0xff]  ;;  %s1081_s5 = scalar_lea.vmem %s656_s10, 128 }
  0x52   :  { %1013 = vmatprep.subr.bf16.mxu1 %v1012_v1  ;;  %v1050_v63 = vpack.c.bf16 %v566_v62, %v565_v61  ;;  %p1082_p8 = scmp.ne.s32.totalorder %s656_s10, %s1081_s5  ;;  %p1087_p10 = scmp.lt.s32.totalorder %s1081_s5, %s1081_s5 }
  0x53   :  { %983 = vmatpush3.bf16.msra.mxu0 %v982_v4 }
  0x54   :  { %1016 = vmatprep.subr.bf16.mxu0 %v1110_v11  ;;  %p1088_p11 = por %p1087_p10, %p1086_p9 }
  0x55   :  { %1015 = vmatpush3.bf16.msra.mxu1 %v1014_v5  ;;  %v666_v5 = vld [vmem:[%s1289_s6] ss:$0 sm:$0xff] }
  0x56   :  { %389 = vmatmul.mubr.f32.vlgmr.msra.gmra.mrb[2].mxu0 %v45_v6  ;;  %1040 = vmatprep.subr.bf16.mxu1 %v1110_v11  ;;  %p1089_p12 = pnand %p1088_p11, %p1082_p8 }
  0x57   :  { %1018 = vmatpush3.bf16.msra.mxu0 %v1017_v12  ;;  %866 = vmatprep.mubr.msk.f32.mxu0 %vm1111_vm0, %v1112_v33 }
  0x58   :  { %459 = vmatmul.mubr.f32.vlgmr.msra.gmra.mrb[2].mxu1 %v47_v7  ;;  %1019 = vmatprep.subr.bf16.mxu0 %v1110_v11 }
  0x59   :  { %885 = vmatprep.mubr.msk.f32.mxu1 %vm1111_vm0, %v1112_v33  ;;  %1042 = vmatpush3.bf16.msra.mxu1 %v1041_v37 }
  0x5a   :  { %1043 = vmatprep.subr.bf16.mxu1 %v1110_v11 }
  0x5b   :  { %1021 = vmatpush3.bf16.msra.mxu0 %v1020_v14 }
  0x5c   :  { %1022 = vmatprep.subr.bf16.mxu0 %v1110_v11 }
  0x5d   :  { %1045 = vmatpush3.bf16.msra.mxu1 %v1044_v39 }
  0x5e   :  { %1046 = vmatprep.subr.bf16.mxu1 %v1110_v11 }
  0x5f   :  { %1024 = vmatpush3.bf16.msra.mxu0 %v1023_v17 }
  0x60   :  { %1025 = vmatprep.subr.bf16.mxu0 %v1110_v11 }
  0x61   :  { %1048 = vmatpush3.bf16.msra.mxu1 %v1047_v42 }
  0x62   :  { %1049 = vmatprep.subr.bf16.mxu1 %v1110_v11 }
  0x63   :  { %1027 = vmatpush3.bf16.msra.mxu0 %v1026_v20 }
  0x64   :  { %1028 = vmatprep.subr.bf16.mxu0 %v1110_v11 }
  0x65   :  { %1051 = vmatpush3.bf16.msra.mxu1 %v1050_v63 }
  0x67   :  { %1030 = vmatpush3.bf16.msra.mxu0 %v1029_v23 }
  0x68   :  { %1031 = vmatprep.subr.bf16.mxu0 %v1110_v11 }
  0x6b   :  { %1033 = vmatpush3.bf16.msra.mxu0 %v1032_v26 }
  0x6c   :  { %1034 = vmatprep.subr.bf16.mxu0 %v1110_v11 }
  0x6f   :  { %1036 = vmatpush3.bf16.msra.mxu0 %v1035_v29 }
  0x70   :  { %1037 = vmatprep.subr.bf16.mxu0 %v1110_v11 }
  0x73   :  { %1039 = vmatpush3.bf16.msra.mxu0 %v1038_v32 }
 0x109   :  { %v700_v43 = vpop.f32.mrb[0].mxu0 }
 0x10a   :  { %v701_v45 = vpop.f32.mrb[1].mxu0 }
 0x10b   :  { %v735_v46 = vpop.f32.mrb[0].mxu1  ;;  %v702_v47 = vadd.f32 %v701_v45, %v700_v43 }
 0x10c   :  { %v736_v48 = vpop.f32.mrb[1].mxu1 }
 0x10d   :  { %v737_v49 = vadd.f32 %v736_v48, %v735_v46  ;;  %v251_v50 = vadd.f32 %v702_v47, %v664_v44 }
 0x10f   :  { %v321_v51 = vadd.f32 %v737_v49, %v251_v50 }
 0x129   :  { %v770_v52 = vpop.f32.mrb[2].mxu0 }
 0x12a   :  { %v771_v53 = vpop.f32.mrb[3].mxu0 }
 0x12b   :  { %v805_v54 = vpop.f32.mrb[2].mxu1  ;;  %v772_v55 = vadd.f32 %v771_v53, %v770_v52 }
 0x12c   :  { %v806_v56 = vpop.f32.mrb[3].mxu1 }
 0x12d   :  { %v807_v57 = vadd.f32 %v806_v56, %v805_v54  ;;  %v391_v58 = vadd.f32 %v772_v55, %v321_v51 }
 0x12f   :  { %v461_v59 = vadd.f32 %v807_v57, %v391_v58 }
 0x131   :  { %v464_v60 = vmax.f32 %v461_v59, 0.0 }
 0x133   :  { %867 = vmatmul.mubr.f32.vlgmr.msra.gmra.mrb[4].mxu0 %v464_v60 }
 0x206   :  { %v554_v1 = vpop.f32.mrb[4].mxu0 }
 0x207   :  { %v555_v2 = vadd.f32 %v665_v0, %v554_v1  ;;  %v868_v3 = vpop.f32.mrb[5].mxu0 }
 0x209   :  { %v558_v4 = vmax.f32 %v555_v2, 0.0 }
 0x20b   :  { %886 = vmatmul.mubr.msk.f32.vlgmr.msra.gmra.mrb[4].mxu1 %vm574_vm1, %v558_v4 }
 0x2de   :  { %v644_v6 = vpop.f32.mrb[4].mxu1 }
 0x2df   :  { %v645_v7 = vadd.f32 %v666_v5, %v644_v6  ;;  %v887_v8 = vpop.f32.mrb[5].mxu1 }
 0x2e1   :  { %648 = vst [vmem:[#allocation5] sm:$0xff] %v645_v7 }
 0x2e2   :  { %1092 = shalt.err (!%p1089_p12)
}
 0x2e3   :  { %s1093_s12 = scalar_lea.hbm %s1290_s7, 128 }
 0x2e4   :  { %p1094_p13 = scmp.ne.s32.totalorder %s1290_s7, %s1093_s12  ;;  %p1097_p0 = scmp.lt.u32.totalorder %s1093_s12, %s1290_s7 }
 0x2e6   :  { %p1099_p1 = pnand %p1097_p0, %p1094_p13 }
 0x2e8   :  { %1102 = shalt.err (!%p1099_p1)
}
 0x2e9   :  { %658 = dma.vmem_to_hbm [thread:$0]  %s656_s10, 128, %s1290_s7, [#allocation4]  }
 0x2ea   :  { %1105 = dma.done.wait [#allocation4], 128  }
 0x2eb   :  { %1106 = vsyncadd [#allocation4], 4294967168 }
 0x2ec   :  { %662 = vsyncpa [#allocation3], 1 }
 0x2ed   :  { %663 = vsyncpa [#allocation4], 1 }

</bundles_post_ra>
